<compile_context>
chip_gen: v7x
topology: tpu7x:2x2x1
jax: 0.10.0
libtpu: 0.0.40
codegen_flags: <defaults>
</compile_context>

<pallas_src>
import functools

import jax
import jax.numpy as jnp
from jax.experimental import pallas as pl
from jax.experimental.pallas import tpu as pltpu


def _round_up(x, m):
    return (x + m - 1) // m * m


def _tcl_kernel(x_ref, c_ref, csq_ref, t_ref, out_ref, *,
                margin, n_valid, tm, padded):
    i = pl.program_id(0)

    x = x_ref[...]            # (tm, D)  native dtype -> MXU lhs
    c = c_ref[...]            # (D, M)   native dtype -> MXU rhs (canonical form)
    c_sq = csq_ref[...]       # (1, M)   f32, lane-major
    t = t_ref[...]            # (tm, 1)  int32

    xf = x.astype(jnp.float32)
    x_sq = jnp.sum(xf * xf, axis=1, keepdims=True)               # (tm, 1)

    # Canonical (tm, K) x (K, M) MXU matmul with f32 accumulation.
    # NOTE: if inputs are bf16 the cross term uses bf16 MXU products with f32
    # accumulation while x_sq/c_sq are f32 upcasts -- slightly different
    # rounding than an all-f32 reference (acceptable tolerance-wise).
    xc = jnp.dot(x, c, preferred_element_type=jnp.float32)       # (tm, M)

    d2 = x_sq + c_sq - 2.0 * xc                                  # squared dists

    col = jax.lax.broadcasted_iota(jnp.int32, d2.shape, 1)
    mask = col == t                                              # one-hot per row
    # Targets outside [0, M) give an all-false row (degenerate, as the original
    # module would misindex); clamp upstream if needed.

    # Exactly one element per row is selected -> masked sum == d2[i, t_i].
    d2_ap = jnp.sum(jnp.where(mask, d2, 0.0), axis=1, keepdims=True)      # (tm,1)
    d2_an = jnp.min(jnp.where(mask, jnp.inf, d2), axis=1, keepdims=True)  # (tm,1)

    # sqrt commutes with max/min/>; clamp + sqrt only the reduced columns.
    dist_ap = jnp.sqrt(jnp.maximum(d2_ap, 1e-12))
    dist_an = jnp.sqrt(jnp.maximum(d2_an, 1e-12))

    loss_col = jnp.maximum(dist_ap - dist_an + jnp.float32(margin), 0.0)
    corr_col = (dist_an > dist_ap).astype(jnp.float32)

    if padded:  # static flag: only emitted when the batch was padded
        row = jax.lax.broadcasted_iota(jnp.int32, (tm, 1), 0)
        valid = (i * tm + row) < n_valid
        loss_col = jnp.where(valid, loss_col, 0.0)
        corr_col = jnp.where(valid, corr_col, 0.0)

    # Per-tile partial sums: each grid step owns its output block, so the
    # batch axis can be "parallel" (race-free across TensorCores).
    out_ref[0, 0] = jnp.sum(loss_col)
    out_ref[0, 1] = jnp.sum(corr_col)


def _pick_row_tile(n, d_lane, m_lane, in_itemsize, budget_bytes=12 << 20):
    """Largest row tile whose per-tile working set fits `budget_bytes`."""
    per_row = (2 * d_lane * in_itemsize      # x tile, double-buffered
               + 2 * 4                       # targets tile, double-buffered
               + 2 * m_lane * 4)             # (tm, M) f32 d2 block + temps
    tm = budget_bytes // per_row
    tm = max(8, min(2048, (tm // 8) * 8))
    return min(tm, _round_up(n, 8))


def triplet_center_loss(inputs, centers, targets, margin, *, row_tile=None):
    """inputs: (N, D), centers: (M, D), targets: (N,) int.

    Returns (loss, prec) as float32 scalars.
    """
    n, d = inputs.shape
    m = centers.shape[0]

    d_lane = _round_up(d, 128)
    m_lane = _round_up(m, 128)
    in_itemsize = jnp.dtype(inputs.dtype).itemsize

    tm = (row_tile if row_tile is not None
          else _pick_row_tile(n, d_lane, m_lane, in_itemsize))
    tm = max(8, _round_up(tm, 8))
    n_pad = _round_up(n, tm)
    num_tiles = n_pad // tm

    x = inputs
    t = targets.astype(jnp.int32).reshape(-1, 1)
    if n_pad != n:
        x = jnp.pad(x, ((0, n_pad - n), (0, 0)))
        t = jnp.pad(t, ((0, n_pad - n), (0, 0)))  # padded rows masked in-kernel

    # Host-side prep: centers as (D, M) -> canonical MXU rhs, no in-kernel
    # transpose; ||c||^2 lane-major (1, M).
    c_t = jnp.transpose(centers)                                       # (D, M)
    c_sq = jnp.sum(centers.astype(jnp.float32) ** 2, axis=1).reshape(1, m)

    # Explicit scoped-VMEM budget (padded layouts, double-buffered blocks).
    tile_bytes = tm * (2 * d_lane * in_itemsize + 2 * 4 + 2 * m_lane * 4)
    const_bytes = 2 * (_round_up(d, 8) * m_lane
                       * jnp.dtype(centers.dtype).itemsize
                       + m_lane * 4)
    vmem_limit = int(min(40 << 20,
                         max(16 << 20, tile_bytes + const_bytes + (4 << 20))))

    kernel = functools.partial(
        _tcl_kernel, margin=float(margin), n_valid=n, tm=tm,
        padded=(n_pad != n))

    partial = pl.pallas_call(
        kernel,
        out_shape=jax.ShapeDtypeStruct((num_tiles, 2), jnp.float32),
        grid=(num_tiles,),
        in_specs=[
            pl.BlockSpec((tm, d), lambda i: (i, 0)),   # input rows (pipelined)
            pl.BlockSpec((d, m), lambda i: (0, 0)),    # centers^T (resident)
            pl.BlockSpec((1, m), lambda i: (0, 0)),    # ||c||^2 (resident)
            pl.BlockSpec((tm, 1), lambda i: (i, 0)),   # targets
        ],
        # One tiny SMEM row of partial sums per tile; final mean done in JAX.
        out_specs=pl.BlockSpec((1, 2), lambda i: (i, 0),
                               memory_space=pltpu.MemorySpace.SMEM),
        # Each tile writes its own output block -> batch axis is "parallel"
        # (both v7x TensorCores split the grid; no-op on v5e/v6e).
        compiler_params=pltpu.CompilerParams(
            dimension_semantics=("parallel",),
            vmem_limit_bytes=vmem_limit),
    )(x, c_t, c_sq, t)

    sums = jnp.sum(partial, axis=0)
    inv_n = jnp.float32(1.0 / n)
    return sums[0] * inv_n, sums[1] * inv_n


class TripletCenter40LossAllClass:
    """JAX/Pallas equivalent of the PyTorch module (forward only)."""

    def __init__(self, margin, class_num, dimension, key):
        self.margin = float(margin)
        # nn.Parameter(torch.randn(class_num, dimension)) -> deterministic init
        self.centers = jax.random.normal(key, (class_num, dimension),
                                         dtype=jnp.float32)

    def __call__(self, inputs, targets, *, row_tile=None):
        return triplet_center_loss(inputs, self.centers, targets, self.margin,
                                   row_tile=row_tile)


def _reference(inputs, centers, targets, margin):
    x_sq = jnp.sum(inputs.astype(jnp.float32) ** 2, axis=1, keepdims=True)
    c_sq = jnp.sum(centers.astype(jnp.float32) ** 2, axis=1, keepdims=True)
    d2 = x_sq + c_sq.T - 2.0 * (inputs.astype(jnp.float32)
                                @ centers.astype(jnp.float32).T)
    dist = jnp.sqrt(jnp.maximum(d2, 1e-12))
    mask = jax.nn.one_hot(targets, centers.shape[0], dtype=bool)
    d_ap = jnp.max(jnp.where(mask, dist, -jnp.inf), axis=1)
    d_an = jnp.min(jnp.where(mask, jnp.inf, dist), axis=1)
    loss = jnp.mean(jnp.maximum(d_ap - d_an + margin, 0.0))
    prec = jnp.mean((d_an > d_ap).astype(jnp.float32))
    return loss, prec


if __name__ == "__main__":
    key = jax.random.PRNGKey(0)
    k_centers, k_inputs, k_targets, k_inputs2, k_targets2 = jax.random.split(key, 5)

    class_num = 40     # M (matches "40" in the module name)
    dimension = 32     # D

    module = TripletCenter40LossAllClass(
        margin=5.0, class_num=class_num, dimension=dimension, key=k_centers)

    # Test 1: single tile, no padding.
    batch = 8
    inputs = jax.random.normal(k_inputs, (batch, dimension), dtype=jnp.float32)
    targets = jax.random.randint(k_targets, (batch,), 0, class_num,
                                 dtype=jnp.int32)
    loss, prec = module(inputs, targets)
    jax.block_until_ready((loss, prec))
    ref_loss, ref_prec = _reference(inputs, module.centers, targets, module.margin)
    assert jnp.allclose(loss, ref_loss, atol=1e-5, rtol=1e-5), (loss, ref_loss)
    assert jnp.allclose(prec, ref_prec, atol=1e-6), (prec, ref_prec)

    # Test 2: forced small row tile -> multiple grid tiles + padded tail rows,
    # exercising the per-tile partial-sum / "parallel" path.
    batch2 = 20
    inputs2 = jax.random.normal(k_inputs2, (batch2, dimension), dtype=jnp.float32)
    targets2 = jax.random.randint(k_targets2, (batch2,), 0, class_num,
                                  dtype=jnp.int32)
    loss2, prec2 = module(inputs2, targets2, row_tile=8)
    jax.block_until_ready((loss2, prec2))
    ref_loss2, ref_prec2 = _reference(inputs2, module.centers, targets2,
                                      module.margin)
    assert jnp.allclose(loss2, ref_loss2, atol=1e-5, rtol=1e-5), (loss2, ref_loss2)
    assert jnp.allclose(prec2, ref_prec2, atol=1e-6), (prec2, ref_prec2)

    print("KERNEL_OK")
</pallas_src>

<mosaic_0001>
module attributes {stable_mosaic.version = 11 : i64} {
  func.func @_tcl_kernel(%arg0: i32, %arg1: memref<8x32xf32, #tpu.memory_space<vmem>>, %arg2: memref<32x40xf32, #tpu.memory_space<vmem>>, %arg3: memref<1x40xf32, #tpu.memory_space<vmem>>, %arg4: memref<8x1xi32, #tpu.memory_space<vmem>>, %arg5: memref<1x2xf32, #tpu.memory_space<smem>>) attributes {dimension_semantics = [#tpu.dimension_semantics<parallel>], iteration_bounds = array<i64: 1>, scalar_prefetch = 0 : i64, scratch_operands = 0 : i64, tpu.core_type = #tpu.core_type<tc>, window_params = [{transform_indices = @transform_0, window_bounds = array<i64: 8, 32>}, {pipeline_mode = #tpu.pipeline_mode<synchronous>, transform_indices = @transform_1, window_bounds = array<i64: 32, 40>}, {pipeline_mode = #tpu.pipeline_mode<synchronous>, transform_indices = @transform_2, window_bounds = array<i64: 1, 40>}, {transform_indices = @transform_3, window_bounds = array<i64: 8, 1>}, {transform_indices = @transform_4, window_bounds = array<i64: 1, 2>}]} {
    %c0 = arith.constant 0 : index
    %c0_0 = arith.constant 0 : index
    %0 = vector.load %arg1[%c0, %c0_0] : memref<8x32xf32, #tpu.memory_space<vmem>>, vector<8x32xf32>
    %c0_1 = arith.constant 0 : index
    %c0_2 = arith.constant 0 : index
    %1 = vector.load %arg2[%c0_1, %c0_2] : memref<32x40xf32, #tpu.memory_space<vmem>>, vector<32x40xf32>
    %c0_3 = arith.constant 0 : index
    %c0_4 = arith.constant 0 : index
    %2 = vector.load %arg3[%c0_3, %c0_4] : memref<1x40xf32, #tpu.memory_space<vmem>>, vector<1x40xf32>
    %c0_5 = arith.constant 0 : index
    %c0_6 = arith.constant 0 : index
    %3 = vector.load %arg4[%c0_5, %c0_6] : memref<8x1xi32, #tpu.memory_space<vmem>>, vector<8x1xi32>
    %4 = arith.mulf %0, %0 : vector<8x32xf32>
    %cst = arith.constant dense<0.000000e+00> : vector<8xf32>
    %5 = vector.multi_reduction <add>, %4, %cst [1] : vector<8x32xf32> to vector<8xf32>
    %6 = vector.shape_cast %5 : vector<8xf32> to vector<8x1xf32>
    %cst_7 = arith.constant dense<0.000000e+00> : vector<8x40xf32>
    %7 = tpu.matmul %0, %1, %cst_7 {dimension_numbers = #tpu.dot_dimension_numbers<[1], [0], [0], [1], [0, 0, 1, 1], [], []>} : vector<8x32xf32>, vector<32x40xf32>, vector<8x40xf32> -> vector<8x40xf32>
    %8 = vector.broadcast %6 : vector<8x1xf32> to vector<8x40xf32>
    %9 = vector.broadcast %2 : vector<1x40xf32> to vector<8x40xf32>
    %10 = arith.addf %8, %9 : vector<8x40xf32>
    %cst_8 = arith.constant 2.000000e+00 : f32
    %11 = vector.broadcast %cst_8 : f32 to vector<8x40xf32>
    %12 = arith.mulf %11, %7 : vector<8x40xf32>
    %13 = arith.subf %10, %12 : vector<8x40xf32>
    %14 = tpu.iota {dimensions = array<i32: 1>} : vector<8x40xi32>
    %15 = vector.broadcast %3 : vector<8x1xi32> to vector<8x40xi32>
    %16 = arith.cmpi eq, %14, %15 : vector<8x40xi32>
    %cst_9 = arith.constant 0.000000e+00 : f32
    %17 = vector.broadcast %cst_9 : f32 to vector<8x40xf32>
    %18 = arith.select %16, %13, %17 : vector<8x40xi1>, vector<8x40xf32>
    %cst_10 = arith.constant dense<0.000000e+00> : vector<8xf32>
    %19 = vector.multi_reduction <add>, %18, %cst_10 [1] : vector<8x40xf32> to vector<8xf32>
    %20 = vector.shape_cast %19 : vector<8xf32> to vector<8x1xf32>
    %cst_11 = arith.constant 0x7F800000 : f32
    %21 = vector.broadcast %cst_11 : f32 to vector<8x40xf32>
    %22 = arith.select %16, %21, %13 : vector<8x40xi1>, vector<8x40xf32>
    %cst_12 = arith.constant dense<0x7F800000> : vector<8xf32>
    %23 = vector.multi_reduction <minimumf>, %22, %cst_12 [1] : vector<8x40xf32> to vector<8xf32>
    %24 = vector.shape_cast %23 : vector<8xf32> to vector<8x1xf32>
    %cst_13 = arith.constant 9.99999996E-13 : f32
    %25 = vector.broadcast %cst_13 : f32 to vector<8x1xf32>
    %26 = arith.maximumf %20, %25 : vector<8x1xf32>
    %27 = math.sqrt %26 : vector<8x1xf32>
    %cst_14 = arith.constant 9.99999996E-13 : f32
    %28 = vector.broadcast %cst_14 : f32 to vector<8x1xf32>
    %29 = arith.maximumf %24, %28 : vector<8x1xf32>
    %30 = math.sqrt %29 : vector<8x1xf32>
    %31 = arith.subf %27, %30 : vector<8x1xf32>
    %cst_15 = arith.constant 5.000000e+00 : f32
    %32 = vector.broadcast %cst_15 : f32 to vector<8x1xf32>
    %33 = arith.addf %31, %32 : vector<8x1xf32>
    %cst_16 = arith.constant 0.000000e+00 : f32
    %34 = vector.broadcast %cst_16 : f32 to vector<8x1xf32>
    %35 = arith.maximumf %33, %34 : vector<8x1xf32>
    %36 = arith.cmpf ogt, %30, %27 : vector<8x1xf32>
    %37 = arith.extui %36 : vector<8x1xi1> to vector<8x1xi32>
    %38 = arith.sitofp %37 : vector<8x1xi32> to vector<8x1xf32>
    %39 = vector.shape_cast %35 : vector<8x1xf32> to vector<1x8x1xf32>
    %cst_17 = arith.constant dense<0.000000e+00> : vector<1xf32>
    %40 = vector.multi_reduction <add>, %39, %cst_17 [1, 2] : vector<1x8x1xf32> to vector<1xf32>
    %41 = vector.shape_cast %40 : vector<1xf32> to vector<1x1x1xf32>
    %42 = vector.extract %41[0, 0, 0] : f32 from vector<1x1x1xf32>
    %c0_18 = arith.constant 0 : index
    %c0_19 = arith.constant 0 : index
    %43 = memref.load %arg5[%c0_18, %c0_19] : memref<1x2xf32, #tpu.memory_space<smem>>
    memref.store %42, %arg5[%c0_18, %c0_19] : memref<1x2xf32, #tpu.memory_space<smem>>
    %44 = vector.shape_cast %38 : vector<8x1xf32> to vector<1x8x1xf32>
    %cst_20 = arith.constant dense<0.000000e+00> : vector<1xf32>
    %45 = vector.multi_reduction <add>, %44, %cst_20 [1, 2] : vector<1x8x1xf32> to vector<1xf32>
    %46 = vector.shape_cast %45 : vector<1xf32> to vector<1x1x1xf32>
    %47 = vector.extract %46[0, 0, 0] : f32 from vector<1x1x1xf32>
    %c0_21 = arith.constant 0 : index
    %c1 = arith.constant 1 : index
    %48 = memref.load %arg5[%c0_21, %c1] : memref<1x2xf32, #tpu.memory_space<smem>>
    memref.store %47, %arg5[%c0_21, %c1] : memref<1x2xf32, #tpu.memory_space<smem>>
    return
  }
  func.func @transform_0(%arg0: i32) -> (i32, i32) {
    %c0_i32 = arith.constant 0 : i32
    %c0_i32_0 = arith.constant 0 : i32
    return %arg0, %c0_i32 : i32, i32
  }
  func.func @transform_1(%arg0: i32) -> (i32, i32) {
    %c0_i32 = arith.constant 0 : i32
    %c0_i32_0 = arith.constant 0 : i32
    %c0_i32_1 = arith.constant 0 : i32
    return %c0_i32, %c0_i32_0 : i32, i32
  }
  func.func @transform_2(%arg0: i32) -> (i32, i32) {
    %c0_i32 = arith.constant 0 : i32
    %c0_i32_0 = arith.constant 0 : i32
    %c0_i32_1 = arith.constant 0 : i32
    return %c0_i32, %c0_i32_0 : i32, i32
  }
  func.func @transform_3(%arg0: i32) -> (i32, i32) {
    %c0_i32 = arith.constant 0 : i32
    %c0_i32_0 = arith.constant 0 : i32
    return %arg0, %c0_i32 : i32, i32
  }
  func.func @transform_4(%arg0: i32) -> (i32, i32) {
    %c0_i32 = arith.constant 0 : i32
    %c0_i32_0 = arith.constant 0 : i32
    return %arg0, %c0_i32 : i32, i32
  }
}

</mosaic_0001>

<bundles_post_ra>
// kernel: tpu_custom_call.1
= control target key start
LH: loop header
LB: loop body
LE: loop exit
PB: predicated region body
PF: predicated region fallthrough
CT: control target
= control target key end

     0   :  { %9 = vsyncpa [#allocation3], 0  ;;  %s348_s0 = inlined_call_operand.vmem [shape: f32[8,32], index: 0, kind: input, shape index: {}]   ;;  %s349_s1 = inlined_call_operand.hbm [shape: f32[32,40], index: 1, kind: input, shape index: {}]   ;;  %s350_s2 = inlined_call_operand.vmem [shape: f32[1,40], index: 2, kind: input, shape index: {}]   ;;  %s351_s3 = inlined_call_operand.vmem [shape: s32[8,1], index: 3, kind: input, shape index: {}]   ;;  %s352_s4 = inlined_call_operand.hbm [shape: f32[1,2], index: 4, kind: output, shape index: {}]  }
   0x1   :  { %10 = vsyncpa [#allocation4], 0  ;;  %s280_s15 = smov [#allocation2]   ;;  %s244_s19 = scalar_lea.hbm %s349_s1, 512 }
   0x2   :  { %s18_s16 = sshll.u32 %s280_s15, 4  ;;  %p245_p0 = scmp.ne.s32.totalorder %s349_s1, %s244_s19  ;;  %s19_s16 = int_to_ptr.vmem [resolvable:$true] %s18_s16 }
   0x3   :  { %p248_p1 = scmp.lt.u32.totalorder %s244_s19, %s349_s1 }
   0x5   :  { %p250_p2 = pnand %p248_p1, %p245_p0 }
   0x7   :  { %253 = shalt.err (!%p250_p2)
}
   0x8   :  { %s254_s24 = scalar_lea.vmem %s19_s16, 512  ;;  %p259_p4 = scmp.lt.s32.totalorder %s19_s16, %s19_s16 }
   0x9   :  { %p255_p3 = scmp.ne.s32.totalorder %s19_s16, %s254_s24  ;;  %p260_p5 = scmp.lt.s32.totalorder %s254_s24, %s254_s24 }
   0xb   :  { %p261_p6 = por %p260_p5, %p259_p4 }
   0xd   :  { %p262_p7 = pnand %p261_p6, %p255_p3 }
   0xf   :  { %265 = shalt.err (!%p262_p7)
}
  0x10   :  { %s281_s25 = smov 128   ;;  %s282_s26 = smov 8  }
  0x11   :  { %24 = dma.hbm_to_vmem [thread:$0]  %s349_s1, 512, %s19_s16, [#allocation3], %s281_s25, %s281_s25, %s282_s26  }
  0x12   :  { %276 = dma.done.wait [#allocation3], 512  }
  0x13   :  { %277 = vsyncadd [#allocation3], 4294966784  ;;  %v283_v0 = vmov 0.0|0.0   ;;  %vm284_vm0 = vmmov 0   ;;  %v285_v1 = vmov 0.0   ;;  %v286_v2 = vmov 0  }
  0x14   :  { %221 = vmatprep.subr.bf16.mxu0 %v283_v0  ;;  %218 = vmatprep.mubr.msk.f32.mxu0 %vm284_vm0, %v285_v1  ;;  %v33_v3 = vld [vmem:[#allocation2] sm:$0xff]  ;;  %v34_v4 = vld [vmem:[#allocation2 + $0x8] sm:$0xff]  ;;  %v35_v5 = vld [vmem:[#allocation2 + $0x10] sm:$0xff]  ;;  %vm40_vm1 = vcmask 261120   ;;  %v126_v13 = vlaneseq  ;;  %vm133_vm3 = vcmask 326656   ;;  %vm163_vm9 = vcmask 7168  }
  0x15   :  { %239 = vset.pattern.permute.xlu0 %v286_v2  ;;  %v222_v6 = vpack.c.bf16 %v34_v4, %v33_v3  ;;  %v36_v7 = vld [vmem:[#allocation2 + $0x18] sm:$0xff]  ;;  %v32_v8 = vld [vmem:[%s348_s0] sm:$0xff]  ;;  %s266_s9 = scalar_lea.hbm %s352_s4, 16 }
  0x16   :  { %v39_v9 = vmul.f32 %v32_v8, %v32_v8  ;;  %v225_v10 = vpack.c.bf16 %v36_v7, %v35_v5  ;;  %v38_v12 = vld [vmem:[%s351_s3] sm:$0xff]  ;;  %v127_v16 = vand.u32 127, %v126_v13  ;;  %p267_p8 = scmp.ne.s32.totalorder %s352_s4, %s266_s9  ;;  %p270_p9 = scmp.lt.u32.totalorder %s266_s9, %s352_s4 }
  0x17   :  { %223 = vmatpush3.bf16.msra.mxu0 %v222_v6  ;;  %v203_v15 = vld [vmem:[%s350_s2] ss:$0 sm:$0xff] }
  0x18   :  { %224 = vmatprep.subr.bf16.mxu0 %v283_v0  ;;  %v41_v11 = vsel %vm40_vm1, %v39_v9, 0.0  ;;  %p272_p10 = pnand %p270_p9, %p267_p8 }
  0x19   :  { %42 = vadd.xlane.f32.xlu0 %v41_v11 }
  0x1b   :  { %226 = vmatpush3.bf16.msra.mxu0 %v225_v10 }
  0x1e   :  { %219 = vmatmul.mubr.msk.f32.vlgmr.msra.gmra.mrb[0].mxu0 %vm40_vm1, %v32_v8 }
  0x2f   :  { %129 = vperm.xlu0 %239, %v38_v12  }
  0xa6   :  { %v43_v14 = vpop.xlane.xlu0 %42 }
  0xa7   :  { %v123_v19 = vadd.f32 %v203_v15, %v43_v14 }
  0xae   :  { %v130_v17 = vpop.permute.xlu0 %129 }
  0xaf   :  { %vm131_vm2 = vcmp.eq.s32.totalorder %v127_v16, %v130_v17 }
  0xf1   :  { %v113_v18 = vpop.f32.mrb[0].mxu0 }
  0xf2   :  { %v124_v20 = vmul.f32 2.0, %v113_v18  ;;  %v220_v21 = vpop.f32.mrb[1].mxu0 }
  0xf4   :  { %v125_v22 = vsub.f32 %v123_v19, %v124_v20 }
  0xf6   :  { %v132_v23 = vsel %vm131_vm2, %v125_v22, 0.0  ;;  %v137_v25 = vsel %vm131_vm2, inf, %v125_v22 }
  0xf7   :  { %v134_v24 = vsel %vm133_vm3, %v132_v23, 0.0  ;;  %v138_v26 = vsel %vm133_vm3, %v137_v25, inf }
  0xf8   :  { %135 = vadd.xlane.f32.xlu1 %v134_v24 }
  0xfc   :  { %139 = vmin.xlane.f32.xlu1 %v138_v26 }
 0x185   :  { %v136_v27 = vpop.xlane.xlu1 %135 }
 0x186   :  { %v141_v28 = vmax.f32 %v136_v27, 1e-12 }
 0x188   :  { %240 = vrsqrt.f32 %v141_v28  ;;  %vm144_vm4 = vcmp.eq.f32.partialorder %v141_v28, inf  ;;  %v147_v36 = vand.u32 2147483648, %v141_v28  ;;  %vm146_vm6 = vcmp.eq.f32.partialorder %v141_v28, 0.0 }
 0x189   :  { %v140_v29 = vpop.xlane.xlu1 %139 }
 0x18a   :  { %v149_v30 = vmax.f32 %v140_v29, 1e-12 }
 0x18c   :  { %242 = vrsqrt.f32 %v149_v30  ;;  %vm152_vm5 = vcmp.eq.f32.partialorder %v149_v30, inf  ;;  %v155_v37 = vand.u32 2147483648, %v149_v30  ;;  %vm154_vm7 = vcmp.eq.f32.partialorder %v149_v30, 0.0 }
 0x192   :  { %v241_v31 = vpop.eup %240 }
 0x193   :  { %v143_v32 = vmul.f32 %v241_v31, %v141_v28 }
 0x195   :  { %v145_v34 = vsel %vm144_vm4, %v141_v28, %v143_v32 }
 0x196   :  { %v243_v33 = vpop.eup %242  ;;  %v148_v39 = vsel %vm146_vm6, %v147_v36, %v145_v34 }
 0x197   :  { %v151_v35 = vmul.f32 %v243_v33, %v149_v30 }
 0x199   :  { %v153_v38 = vsel %vm152_vm5, %v149_v30, %v151_v35 }
 0x19a   :  { %v156_v40 = vsel %vm154_vm7, %v155_v37, %v153_v38 }
 0x19b   :  { %v157_v41 = vsub.f32 %v148_v39, %v156_v40  ;;  %vm160_vm8 = vcmp.gt.f32.partialorder %v156_v40, %v148_v39 }
 0x19c   :  { %v204_v45 = vsel %vm160_vm8, 1.0, %v285_v1 }
 0x19d   :  { %v158_v42 = vadd.f32 5.0, %v157_v41  ;;  %v176_v46 = vsel %vm163_vm9, %v204_v45, 0.0 }
 0x19f   :  { %v159_v43 = vmax.f32 %v158_v42, 0.0 }
 0x1a1   :  { %v164_v44 = vsel %vm163_vm9, %v159_v43, 0.0 }
 0x1a2   :  { %165 = vadd.xlane.f32.xlu1 %v164_v44 }
 0x1a6   :  { %177 = vadd.xlane.f32.xlu1 %v176_v46 }
 0x22f   :  { %v166_v47 = vpop.xlane.xlu1 %165 }
 0x230   :  { %v167_v48 = vrot.slane %v166_v47, 4 }
 0x232   :  { %v168_v49 = vadd.f32 %v167_v48, %v166_v47 }
 0x233   :  { %v178_v50 = vpop.xlane.xlu1 %177 }
 0x234   :  { %v169_v51 = vrot.slane %v168_v49, 2  ;;  %v179_v52 = vrot.slane %v178_v50, 4 }
 0x236   :  { %v180_v53 = vadd.f32 %v179_v52, %v178_v50  ;;  %v170_v54 = vadd.f32 %v169_v51, %v168_v49 }
 0x238   :  { %v181_v55 = vrot.slane %v180_v53, 2  ;;  %v171_v56 = vrot.slane %v170_v54, 1 }
 0x23a   :  { %v182_v57 = vadd.f32 %v181_v55, %v180_v53  ;;  %v172_v58 = vadd.f32 %v171_v56, %v170_v54 }
 0x23c   :  { %227 = vpush %v172_v58  ;;  %v183_v59 = vrot.slane %v182_v57, 1 }
 0x23e   :  { %v184_v60 = vadd.f32 %v183_v59, %v182_v57 }
 0x240   :  { %229 = vpush %v184_v60 }
 0x26d   :  { %s228_s0 = spop %227 }
 0x26e   :  { %175 = sst [smem:[#allocation5]] %s228_s0 }
 0x271   :  { %s230_s2 = spop %229 }
 0x272   :  { %187 = sst [smem:[#allocation5 + $0x1]] %s230_s2 }
 0x273   :  { %275 = shalt.err (!%p272_p10)
}
 0x274   :  { %s287_s14 = smov [#allocation5]  }
 0x275   :  { %195 = dma.smem_to_hbm %s287_s14, 16, %s352_s4, [#allocation4]  }
 0x276   :  { %278 = dma.done.wait [#allocation4], 16  }
 0x277   :  { %279 = vsyncadd [#allocation4], 4294967280 }
 0x278   :  { %199 = sfence }
 0x279   :  { %200 = vsyncpa [#allocation3], 1 }
 0x27a   :  { %201 = vsyncpa [#allocation4], 1 }

</bundles_post_ra>
